<compile_context>
chip_gen: v6e
topology: v6e:2x2x1
jax: 0.10.0
libtpu: 0.0.40
codegen_flags: <defaults>
</compile_context>

<pallas_src>
import jax
import jax.numpy as jnp
from jax.experimental import pallas as pl
from jax.experimental.pallas import tpu as pltpu


_NATIVE_EUP_DTYPES = (jnp.dtype(jnp.float32), jnp.dtype(jnp.bfloat16))


def _tanh_kernel(x_ref, o_ref):
    x = x_ref[...]
    # f32 / bf16 go through the EUP at native width (v6e/v7x have a bf16 EUP;
    # Mosaic extends internally on v5e). Everything else (f16, ints, bool) is
    # upcast to f32 in-register, so no extra HBM pass is needed anywhere.
    if jnp.dtype(x.dtype) not in _NATIVE_EUP_DTYPES:
        x = x.astype(jnp.float32)
    # jnp.tanh is a single EUP transcendental and saturates correctly for
    # large |x| (the module's two-exp formula overflows to NaN there).
    o_ref[...] = jnp.tanh(x).astype(o_ref.dtype)


def _sublane_multiple(itemsize):
    # Native sublane packing per dtype width (f32:8, bf16/f16:16, int8/bool:32).
    return {4: 8, 2: 16, 1: 32}.get(itemsize, 8)


def tanh_pallas(x):
    """Elementwise tanh via a Pallas TPU kernel. Accepts any shape / dtype."""
    orig_shape = x.shape
    orig_dtype = x.dtype

    # TPU has no native f64; downcast explicitly (only hit when x64 is enabled).
    if x.dtype == jnp.float64:
        x = x.astype(jnp.float32)

    in_dtype = x.dtype
    # PyTorch's Tanh demands a FloatTensor; we accept non-float inputs and
    # return float32 (the cast happens inside the kernel, not as its own pass).
    out_dtype = in_dtype if jnp.issubdtype(in_dtype, jnp.floating) else jnp.float32

    n = x.size
    if n == 0:
        return jnp.zeros(orig_shape, out_dtype)

    in_itemsize = jnp.dtype(in_dtype).itemsize
    out_itemsize = jnp.dtype(out_dtype).itemsize

    # ---- Copy-free 2-D view --------------------------------------------------
    pad = 0
    if n % 128 == 0:
        # Widest lane width in {1024,...,128} that divides n: fully lane-dense,
        # unmasked stores, zero padding anywhere.
        lane = next(c for c in (1024, 512, 256, 128) if n % c == 0)
        x2d = x.reshape(n // lane, lane)
        lane_padded = lane
    elif x.ndim >= 2 and x.shape[-1] <= 2048:
        # Ragged flat size: keep the tensor's own trailing dim (free reshape).
        # Pallas pads lanes inside the VMEM block only.
        lane = x.shape[-1]
        x2d = x.reshape(-1, lane)
        lane_padded = -(-lane // 128) * 128
    else:
        # Rare: ragged 1-D (or huge ragged trailing dim). Pad to a 128 multiple;
        # costs one extra HBM pass each way.
        # TODO(synk): handle this tail in-kernel via a scalar-prefetched length
        # and masked pltpu.store to drop the pad/slice passes entirely.
        flat = x.reshape(-1)
        lane = 128
        pad = (-n) % lane
        flat = jnp.pad(flat, (0, pad))
        x2d = flat.reshape(-1, lane)
        lane_padded = lane

    rows = x2d.shape[0]

    # ---- Tile sizing ----------------------------------------------------------
    # ~6 MiB per array block; in + out double-buffered = ~24 MiB VMEM.
    target_block_bytes = 6 * 1024 * 1024
    sublane_mult = max(_sublane_multiple(in_itemsize), _sublane_multiple(out_itemsize))
    blk_itemsize = max(in_itemsize, out_itemsize)
    tile_rows = max(
        sublane_mult,
        (target_block_bytes // (lane_padded * blk_itemsize)) // sublane_mult * sublane_mult,
    )
    # Keep >= 4 grid steps for mid-sized inputs so the pipeline double-buffers
    # and v7x's two TensorCores both get work (2 TCs x >=2 steps each).
    quarter_rows = (rows // 4) // sublane_mult * sublane_mult
    if quarter_rows >= sublane_mult:
        tile_rows = min(tile_rows, quarter_rows)
    if tile_rows >= rows:
        tile_rows = rows  # tiny input: a single full-extent block (always legal)

    grid = (pl.cdiv(rows, tile_rows),)  # ragged final row-block is masked by Pallas

    out2d = pl.pallas_call(
        _tanh_kernel,
        out_shape=jax.ShapeDtypeStruct((rows, lane), out_dtype),
        grid_spec=pltpu.PrefetchScalarGridSpec(
            num_scalar_prefetch=0,
            grid=grid,
            in_specs=[pl.BlockSpec((tile_rows, lane), lambda i: (i, 0))],
            out_specs=pl.BlockSpec((tile_rows, lane), lambda i: (i, 0)),
        ),
        compiler_params=pltpu.CompilerParams(
            # Splits the grid across v7x's 2 TensorCores; near-neutral on v5e/v6e.
            dimension_semantics=("parallel",),
            # Above v5e's 16 MiB scoped default, below v7x's 64 MiB physical VMEM.
            vmem_limit_bytes=48 * 1024 * 1024,
        ),
        cost_estimate=pl.CostEstimate(
            flops=0,
            transcendentals=rows * lane,
            bytes_accessed=rows * lane * (in_itemsize + out_itemsize),
        ),
    )(x2d)

    if pad:
        out = out2d.reshape(-1)[:n].reshape(orig_shape)
    else:
        out = out2d.reshape(orig_shape)
    if jnp.issubdtype(orig_dtype, jnp.floating) and out.dtype != orig_dtype:
        out = out.astype(orig_dtype)  # only the rare float64 path hits this
    return out


if __name__ == "__main__":
    key = jax.random.PRNGKey(0)

    # Module-shaped small input (NCHW-style): batch=2, channels=4, spatial=16.
    x = jax.random.normal(key, (2, 4, 16, 16), dtype=jnp.float32)
    y = tanh_pallas(x)
    jax.block_until_ready(y)
    # Reference = the exact formula from the PyTorch module (well-conditioned
    # for O(1) inputs).
    ref = (jnp.exp(x) - jnp.exp(-x)) / (jnp.exp(x) + jnp.exp(-x))
    assert y.shape == x.shape and y.dtype == x.dtype
    assert jnp.max(jnp.abs(y - ref)) < 1e-5

    # Multi-step grid path (>= 4 pipelined blocks).
    x_big = jax.random.normal(key, (32, 4, 16, 16), dtype=jnp.float32)
    y_big = tanh_pallas(x_big)
    jax.block_until_ready(y_big)
    assert jnp.max(jnp.abs(y_big - jnp.tanh(x_big))) < 1e-5

    # Saturation: raw two-exp formula would overflow to NaN; tanh saturates.
    x_sat = jnp.array([[-200.0, -1.0, 0.0, 1.0, 200.0]], dtype=jnp.float32)
    y_sat = tanh_pallas(x_sat)
    jax.block_until_ready(y_sat)
    assert jnp.max(jnp.abs(y_sat - jnp.tanh(x_sat))) < 1e-6

    # bf16: stays 16-bit end to end (native bf16 tanh, no f32 round trip).
    x_bf16 = jax.random.normal(key, (2, 4, 16, 16), dtype=jnp.bfloat16)
    y_bf16 = tanh_pallas(x_bf16)
    jax.block_until_ready(y_bf16)
    assert y_bf16.dtype == jnp.bfloat16
    assert jnp.max(jnp.abs(y_bf16.astype(jnp.float32)
                           - jnp.tanh(x_bf16.astype(jnp.float32)))) < 3e-2

    # Ragged flat size (not a multiple of 128): no pad/slice HBM passes.
    x_rag = jax.random.normal(key, (3, 5, 7), dtype=jnp.float32)
    y_rag = tanh_pallas(x_rag)
    jax.block_until_ready(y_rag)
    assert y_rag.shape == x_rag.shape
    assert jnp.max(jnp.abs(y_rag - jnp.tanh(x_rag))) < 1e-5

    # Ragged 1-D fallback path.
    x_1d = jax.random.normal(key, (1000,), dtype=jnp.float32)
    y_1d = tanh_pallas(x_1d)
    jax.block_until_ready(y_1d)
    assert jnp.max(jnp.abs(y_1d - jnp.tanh(x_1d))) < 1e-5

    # Non-float input: cast happens inside the kernel, output is float32.
    # (PyTorch's module would raise here; we return the mathematical result.)
    x_int = jnp.arange(-8, 8, dtype=jnp.int32).reshape(4, 4)
    y_int = tanh_pallas(x_int)
    jax.block_until_ready(y_int)
    assert y_int.dtype == jnp.float32
    assert jnp.max(jnp.abs(y_int - jnp.tanh(x_int.astype(jnp.float32)))) < 1e-5

    # TODO(synk): backward() and torch-type validation from the PyTorch module
    # are not part of the forward kernel (JAX autodiff of jnp.tanh covers backward).
    print("KERNEL_OK")
</pallas_src>

<mosaic_0001>
module attributes {stable_mosaic.version = 11 : i64} {
  func.func @_tanh_kernel(%arg0: i32, %arg1: memref<2x1024xf32, #tpu.memory_space<vmem>>, %arg2: memref<2x1024xf32, #tpu.memory_space<vmem>>) attributes {dimension_semantics = [#tpu.dimension_semantics<parallel>], iteration_bounds = array<i64: 1>, scalar_prefetch = 0 : i64, scratch_operands = 0 : i64, tpu.core_type = #tpu.core_type<tc>, window_params = [{transform_indices = @transform_0, window_bounds = array<i64: 2, 1024>}, {transform_indices = @transform_1, window_bounds = array<i64: 2, 1024>}]} {
    %c0 = arith.constant 0 : index
    %c0_0 = arith.constant 0 : index
    %0 = vector.load %arg1[%c0, %c0_0] : memref<2x1024xf32, #tpu.memory_space<vmem>>, vector<2x1024xf32>
    %1 = math.tanh %0 : vector<2x1024xf32>
    %c0_1 = arith.constant 0 : index
    %c0_2 = arith.constant 0 : index
    %2 = vector.load %arg2[%c0_1, %c0_2] : memref<2x1024xf32, #tpu.memory_space<vmem>>, vector<2x1024xf32>
    tpu.vector_store %arg2[%c0_1, %c0_2], %1 {strides = array<i32>} : memref<2x1024xf32, #tpu.memory_space<vmem>>, vector<2x1024xf32>,
    return
  }
  func.func @transform_0(%arg0: i32) -> (i32, i32) {
    %c0_i32 = arith.constant 0 : i32
    %c0_i32_0 = arith.constant 0 : i32
    return %arg0, %c0_i32 : i32, i32
  }
  func.func @transform_1(%arg0: i32) -> (i32, i32) {
    %c0_i32 = arith.constant 0 : i32
    %c0_i32_0 = arith.constant 0 : i32
    return %arg0, %c0_i32 : i32, i32
  }
}

</mosaic_0001>

<bundles_post_ra>
// kernel: tpu_custom_call.1
= control target key start
LH: loop header
LB: loop body
LE: loop exit
PB: predicated region body
PF: predicated region fallthrough
CT: control target
= control target key end

     0   :  { %6 = vsyncpa [#allocation3], 0  ;;  %s110_s0 = inlined_call_operand.hbm [shape: f32[2,1024], index: 0, kind: input, shape index: {}]   ;;  %s111_s1 = inlined_call_operand.hbm [shape: f32[2,1024], index: 1, kind: output, shape index: {}]  }
   0x1   :  { %7 = vsyncpa [#allocation4], 0  ;;  %s92_s6 = smov [#allocation2]  }
   0x2   :  { %s14_s7 = sshll.u32 %s92_s6, 4  ;;  %s15_s7 = int_to_ptr.vmem [resolvable:$true] %s14_s7 }
   0x3   :  { %s56_s8 = scalar_lea.vmem %s15_s7, 256  ;;  %p61_p1 = scmp.lt.s32.totalorder %s15_s7, %s15_s7 }
   0x4   :  { %p57_p0 = scmp.ne.s32.totalorder %s15_s7, %s56_s8  ;;  %p62_p2 = scmp.lt.s32.totalorder %s56_s8, %s56_s8 }
   0x6   :  { %p63_p3 = por %p62_p2, %p61_p1 }
   0x8   :  { %p64_p4 = pnand %p63_p3, %p57_p0 }
   0xa   :  { %67 = shalt.err (!%p64_p4)
}
   0xb   :  { %17 = dma.hbm_to_vmem [thread:$0]  %s110_s0, 256, %s15_s7, [#allocation3]  }
   0xc   :  { %88 = dma.done.wait [#allocation3], 256  }
   0xd   :  { %89 = vsyncadd [#allocation3], 4294967040  ;;  %v21_v0 = vld [vmem:[#allocation2] sm:$0xff]  ;;  %v22_v1 = vld [vmem:[#allocation2 + $0x8] sm:$0xff]  ;;  %s93_s11 = smov [#allocation5]  }
   0xe   :  { %44 = vtanh.f32 %v21_v0  ;;  %s33_s12 = sshll.u32 %s93_s11, 4  ;;  %s34_s12 = int_to_ptr.vmem [resolvable:$true] %s33_s12 }
   0xf   :  { %46 = vtanh.f32 %v22_v1  ;;  %s68_s13 = scalar_lea.vmem %s34_s12, 256  ;;  %p73_p6 = scmp.lt.s32.totalorder %s34_s12, %s34_s12 }
  0x10   :  { %p69_p5 = scmp.ne.s32.totalorder %s34_s12, %s68_s13  ;;  %p74_p7 = scmp.lt.s32.totalorder %s68_s13, %s68_s13 }
  0x12   :  { %p75_p8 = por %p74_p7, %p73_p6 }
  0x14   :  { %p76_p9 = pnand %p75_p8, %p69_p5 }
  0x1b   :  { %v45_v2 = vpop.eup %44 }
  0x1c   :  { %v47_v3 = vpop.eup %46  ;;  %25 = vst [vmem:[#allocation5] sm:$0xff] %v45_v2 }
  0x1d   :  { %26 = vst [vmem:[#allocation5 + $0x8] sm:$0xff] %v47_v3 }
  0x1e   :  { %79 = shalt.err (!%p76_p9)
}
  0x1f   :  { %36 = dma.vmem_to_hbm [thread:$0]  %s34_s12, 256, %s111_s1, [#allocation4]  }
  0x20   :  { %90 = dma.done.wait [#allocation4], 256  }
  0x21   :  { %91 = vsyncadd [#allocation4], 4294967040 }
  0x22   :  { %40 = vsyncpa [#allocation3], 1 }
  0x23   :  { %41 = vsyncpa [#allocation4], 1 }

</bundles_post_ra>
